<compile_context>
chip_gen: v7x
topology: tpu7x:2x2x1
jax: 0.10.0
libtpu: 0.0.40
codegen_flags: <defaults>
</compile_context>

<pallas_src>
import jax
import jax.numpy as jnp
from jax.experimental import pallas as pl
from jax.experimental.pallas import tpu as pltpu

LANE_PAD = 128  # pad the 10-wide class dim to a full lane width


def mlp_kernel(x_ref, w1_ref, b1_ref, w2_ref, b2_ref, o_ref):
    # hidden = sigmoid(x @ W1 + b1)   (bf16 MXU inputs, f32 accumulate)
    x = x_ref[...].astype(jnp.bfloat16)          # no-op if x is already bf16
    h = jnp.dot(x, w1_ref[...], preferred_element_type=jnp.float32) + b1_ref[...]
    h = 0.5 * jnp.tanh(0.5 * h) + 0.5            # sigmoid via one EUP op (tanh)

    # logits = h @ W2 + b2   (W2/b2 pre-padded to 128 lanes; pad bias = -1e30)
    z = jnp.dot(h.astype(jnp.bfloat16), w2_ref[...],
                preferred_element_type=jnp.float32) + b2_ref[...]

    # numerically stable softmax over the (padded) last axis; pad lanes -> exp == 0
    z = z - jnp.max(z, axis=-1, keepdims=True)
    e = jnp.exp(z)
    # exact divide here (one value per row); approx reciprocal broke sum-to-1
    o_ref[...] = (e / jnp.sum(e, axis=-1, keepdims=True)).astype(o_ref.dtype)


def _round_up(n, m):
    return ((n + m - 1) // m) * m


def prepare_params(w1, b1, w2, b2):
    """One-time parameter prep (outside the per-call hot path):
    transpose to [in, out], cast MXU operands to bf16, pad logits to 128 lanes."""
    w1_t = jnp.asarray(w1.T, dtype=jnp.bfloat16)                 # [784, 256]
    b1_2d = jnp.asarray(b1, dtype=jnp.float32).reshape(1, 256)   # [1, 256]
    w2_t = jnp.zeros((256, LANE_PAD), dtype=jnp.bfloat16)
    w2_t = w2_t.at[:, :10].set(w2.T.astype(jnp.bfloat16))        # [256, 128]
    # Pad-lane bias is a large negative constant so exp() of those lanes is 0.
    b2_2d = jnp.full((1, LANE_PAD), -1e30, dtype=jnp.float32)
    b2_2d = b2_2d.at[0, :10].set(b2.astype(jnp.float32))         # [1, 128]
    return w1_t, b1_2d, w2_t, b2_2d


def network_forward(x, params, *, block_b=512, out_dtype=jnp.float32,
                    full_padded_output=False):
    """x: [B, 784] f32 (or bf16 for the fast path); params from prepare_params.
    Returns [B, 10] probabilities (out_dtype), or the raw padded (b_pad, 128)
    buffer if full_padded_output=True (real values in [:B, :10], pad lanes 0)."""
    w1_t, b1_2d, w2_t, b2_2d = params
    B, D = x.shape
    assert D == 784

    # Batch tile: big (amortize ~0.35us/step overhead, reach HBM roofline), but
    # multiple of 8 and capped so the grid has >= 2 steps when B > 8 (v7x has
    # 2 TensorCores and the "parallel" axis is how they both get work).
    tb = min(block_b, _round_up(B, 8))
    if B > 8:
        tb = min(tb, max(8, _round_up(-(-B // 2), 8)))
    b_pad = _round_up(B, tb)
    if b_pad != B:
        x = jnp.pad(x, ((0, b_pad - B), (0, 0)))

    resident = dict(pipeline_mode=pl.Buffered(1))  # constant index map -> 1 buffer

    out = pl.pallas_call(
        mlp_kernel,
        out_shape=jax.ShapeDtypeStruct((b_pad, LANE_PAD), out_dtype),
        grid=(b_pad // tb,),
        in_specs=[
            pl.BlockSpec((tb, 784), lambda i: (i, 0)),                    # x tile (pipelined)
            pl.BlockSpec((784, 256), lambda i: (0, 0), **resident),       # W1 resident
            pl.BlockSpec((1, 256), lambda i: (0, 0), **resident),         # b1 resident
            pl.BlockSpec((256, LANE_PAD), lambda i: (0, 0), **resident),  # W2 resident
            pl.BlockSpec((1, LANE_PAD), lambda i: (0, 0), **resident),    # b2 resident
        ],
        out_specs=pl.BlockSpec((tb, LANE_PAD), lambda i: (i, 0)),
        compiler_params=pltpu.CompilerParams(
            dimension_semantics=("parallel",),        # megacore-shard batch (v7x)
            vmem_limit_bytes=48 * 1024 * 1024,        # clear v5e's 16 MiB default
        ),
    )(x, w1_t, b1_2d, w2_t, b2_2d)

    if full_padded_output:
        return out  # (b_pad, 128): skip the extra slice pass; consumer slices/argmaxes
    return out[:B, :10]


def _reference_f32(x, w1, b1, w2, b2):
    h = jax.nn.sigmoid(x @ w1.T + b1)
    return jax.nn.softmax(h @ w2.T + b2, axis=-1)


def _reference_bf16(x, w1, b1, w2, b2):
    # Same bf16-operand / f32-accumulate matmul semantics as the kernel.
    h = jnp.dot(x.astype(jnp.bfloat16), w1.T.astype(jnp.bfloat16),
                preferred_element_type=jnp.float32) + b1
    h = jax.nn.sigmoid(h)
    z = jnp.dot(h.astype(jnp.bfloat16), w2.T.astype(jnp.bfloat16),
                preferred_element_type=jnp.float32) + b2
    return jax.nn.softmax(z, axis=-1)


if __name__ == "__main__":
    key = jax.random.PRNGKey(0)
    k_x, k_w1, k_b1, k_w2, k_b2 = jax.random.split(key, 5)

    B = 12  # deliberately not a multiple of the batch tile -> exercises padding
    bound1 = 1.0 / jnp.sqrt(784.0)
    bound2 = 1.0 / jnp.sqrt(256.0)
    x = jax.random.normal(k_x, (B, 784), dtype=jnp.float32)
    w1 = jax.random.uniform(k_w1, (256, 784), jnp.float32, -bound1, bound1)
    b1 = jax.random.uniform(k_b1, (256,), jnp.float32, -bound1, bound1)
    w2 = jax.random.uniform(k_w2, (10, 256), jnp.float32, -bound2, bound2)
    b2 = jax.random.uniform(k_b2, (10,), jnp.float32, -bound2, bound2)

    params = prepare_params(w1, b1, w2, b2)
    ref16 = _reference_bf16(x, w1, b1, w2, b2)
    ref32 = _reference_f32(x, w1, b1, w2, b2)

    # Default (module-faithful) path: f32 [B, 10]; B=12 -> tb=8, grid=(2,).
    out = network_forward(x, params)
    jax.block_until_ready(out)
    assert out.shape == (B, 10)
    assert jnp.allclose(out, ref16, atol=5e-3, rtol=0.0), \
        float(jnp.max(jnp.abs(out - ref16)))
    assert jnp.allclose(out, ref32, atol=3e-2, rtol=0.0), \
        float(jnp.max(jnp.abs(out - ref32)))
    assert jnp.allclose(jnp.sum(out, axis=-1), 1.0, atol=1e-3)

    # Fast-path output contract: bf16, padded (b_pad, 128), no slice pass.
    out_fast = network_forward(x, params, out_dtype=jnp.bfloat16,
                               full_padded_output=True)
    jax.block_until_ready(out_fast)
    assert out_fast.shape[1] == LANE_PAD and out_fast.dtype == jnp.bfloat16
    assert jnp.allclose(out_fast[:B, :10].astype(jnp.float32), ref16,
                        atol=2e-2, rtol=0.0)
    assert jnp.allclose(out_fast[:B, 10:].astype(jnp.float32), 0.0)

    print("KERNEL_OK")
</pallas_src>

<mosaic_0001>
module attributes {stable_mosaic.version = 11 : i64} {
  func.func @mlp_kernel(%arg0: i32, %arg1: memref<8x784xf32, #tpu.memory_space<vmem>>, %arg2: memref<784x256xbf16, #tpu.memory_space<vmem>>, %arg3: memref<1x256xf32, #tpu.memory_space<vmem>>, %arg4: memref<256x128xbf16, #tpu.memory_space<vmem>>, %arg5: memref<1x128xf32, #tpu.memory_space<vmem>>, %arg6: memref<8x128xf32, #tpu.memory_space<vmem>>) attributes {dimension_semantics = [#tpu.dimension_semantics<parallel>], iteration_bounds = array<i64: 2>, scalar_prefetch = 0 : i64, scratch_operands = 0 : i64, tpu.core_type = #tpu.core_type<tc>, window_params = [{transform_indices = @transform_0, window_bounds = array<i64: 8, 784>}, {pipeline_mode = #tpu.pipeline_mode<synchronous>, transform_indices = @transform_1, window_bounds = array<i64: 784, 256>}, {pipeline_mode = #tpu.pipeline_mode<synchronous>, transform_indices = @transform_2, window_bounds = array<i64: 1, 256>}, {pipeline_mode = #tpu.pipeline_mode<synchronous>, transform_indices = @transform_3, window_bounds = array<i64: 256, 128>}, {pipeline_mode = #tpu.pipeline_mode<synchronous>, transform_indices = @transform_4, window_bounds = array<i64: 1, 128>}, {transform_indices = @transform_5, window_bounds = array<i64: 8, 128>}]} {
    %c0 = arith.constant 0 : index
    %c0_0 = arith.constant 0 : index
    %0 = vector.load %arg1[%c0, %c0_0] : memref<8x784xf32, #tpu.memory_space<vmem>>, vector<8x784xf32>
    %1 = arith.truncf %0 : vector<8x784xf32> to vector<8x784xbf16>
    %c0_1 = arith.constant 0 : index
    %c0_2 = arith.constant 0 : index
    %2 = vector.load %arg2[%c0_1, %c0_2] : memref<784x256xbf16, #tpu.memory_space<vmem>>, vector<784x256xbf16>
    %cst = arith.constant dense<0.000000e+00> : vector<8x256xf32>
    %3 = tpu.matmul %1, %2, %cst {dimension_numbers = #tpu.dot_dimension_numbers<[1], [0], [0], [1], [0, 0, 1, 1], [], []>} : vector<8x784xbf16>, vector<784x256xbf16>, vector<8x256xf32> -> vector<8x256xf32>
    %c0_3 = arith.constant 0 : index
    %c0_4 = arith.constant 0 : index
    %4 = vector.load %arg3[%c0_3, %c0_4] : memref<1x256xf32, #tpu.memory_space<vmem>>, vector<1x256xf32>
    %5 = vector.broadcast %4 : vector<1x256xf32> to vector<8x256xf32>
    %6 = arith.addf %3, %5 : vector<8x256xf32>
    %cst_5 = arith.constant 5.000000e-01 : f32
    %7 = vector.broadcast %cst_5 : f32 to vector<8x256xf32>
    %8 = arith.mulf %7, %6 : vector<8x256xf32>
    %9 = math.tanh %8 : vector<8x256xf32>
    %cst_6 = arith.constant 5.000000e-01 : f32
    %10 = vector.broadcast %cst_6 : f32 to vector<8x256xf32>
    %11 = arith.mulf %10, %9 : vector<8x256xf32>
    %cst_7 = arith.constant 5.000000e-01 : f32
    %12 = vector.broadcast %cst_7 : f32 to vector<8x256xf32>
    %13 = arith.addf %11, %12 : vector<8x256xf32>
    %14 = arith.truncf %13 : vector<8x256xf32> to vector<8x256xbf16>
    %c0_8 = arith.constant 0 : index
    %c0_9 = arith.constant 0 : index
    %15 = vector.load %arg4[%c0_8, %c0_9] : memref<256x128xbf16, #tpu.memory_space<vmem>>, vector<256x128xbf16>
    %cst_10 = arith.constant dense<0.000000e+00> : vector<8x128xf32>
    %16 = tpu.matmul %14, %15, %cst_10 {dimension_numbers = #tpu.dot_dimension_numbers<[1], [0], [0], [1], [0, 0, 1, 1], [], []>} : vector<8x256xbf16>, vector<256x128xbf16>, vector<8x128xf32> -> vector<8x128xf32>
    %c0_11 = arith.constant 0 : index
    %c0_12 = arith.constant 0 : index
    %17 = vector.load %arg5[%c0_11, %c0_12] : memref<1x128xf32, #tpu.memory_space<vmem>>, vector<1x128xf32>
    %18 = vector.broadcast %17 : vector<1x128xf32> to vector<8x128xf32>
    %19 = arith.addf %16, %18 : vector<8x128xf32>
    %cst_13 = arith.constant dense<0xFF800000> : vector<8xf32>
    %20 = vector.multi_reduction <maximumf>, %19, %cst_13 [1] : vector<8x128xf32> to vector<8xf32>
    %21 = vector.shape_cast %20 : vector<8xf32> to vector<8x1xf32>
    %22 = vector.broadcast %21 : vector<8x1xf32> to vector<8x128xf32>
    %23 = arith.subf %19, %22 : vector<8x128xf32>
    %24 = math.exp %23 : vector<8x128xf32>
    %cst_14 = arith.constant dense<0.000000e+00> : vector<8xf32>
    %25 = vector.multi_reduction <add>, %24, %cst_14 [1] : vector<8x128xf32> to vector<8xf32>
    %26 = vector.shape_cast %25 : vector<8xf32> to vector<8x1xf32>
    %27 = vector.broadcast %26 : vector<8x1xf32> to vector<8x128xf32>
    %28 = arith.divf %24, %27 : vector<8x128xf32>
    %c0_15 = arith.constant 0 : index
    %c0_16 = arith.constant 0 : index
    %29 = vector.load %arg6[%c0_15, %c0_16] : memref<8x128xf32, #tpu.memory_space<vmem>>, vector<8x128xf32>
    tpu.vector_store %arg6[%c0_15, %c0_16], %28 {strides = array<i32>} : memref<8x128xf32, #tpu.memory_space<vmem>>, vector<8x128xf32>,
    return
  }
  func.func @transform_0(%arg0: i32) -> (i32, i32) {
    %c0_i32 = arith.constant 0 : i32
    %c0_i32_0 = arith.constant 0 : i32
    return %arg0, %c0_i32 : i32, i32
  }
  func.func @transform_1(%arg0: i32) -> (i32, i32) {
    %c0_i32 = arith.constant 0 : i32
    %c0_i32_0 = arith.constant 0 : i32
    %c0_i32_1 = arith.constant 0 : i32
    return %c0_i32, %c0_i32_0 : i32, i32
  }
  func.func @transform_2(%arg0: i32) -> (i32, i32) {
    %c0_i32 = arith.constant 0 : i32
    %c0_i32_0 = arith.constant 0 : i32
    %c0_i32_1 = arith.constant 0 : i32
    return %c0_i32, %c0_i32_0 : i32, i32
  }
  func.func @transform_3(%arg0: i32) -> (i32, i32) {
    %c0_i32 = arith.constant 0 : i32
    %c0_i32_0 = arith.constant 0 : i32
    %c0_i32_1 = arith.constant 0 : i32
    return %c0_i32, %c0_i32_0 : i32, i32
  }
  func.func @transform_4(%arg0: i32) -> (i32, i32) {
    %c0_i32 = arith.constant 0 : i32
    %c0_i32_0 = arith.constant 0 : i32
    %c0_i32_1 = arith.constant 0 : i32
    return %c0_i32, %c0_i32_0 : i32, i32
  }
  func.func @transform_5(%arg0: i32) -> (i32, i32) {
    %c0_i32 = arith.constant 0 : i32
    %c0_i32_0 = arith.constant 0 : i32
    return %arg0, %c0_i32 : i32, i32
  }
}

</mosaic_0001>

<bundles_post_ra>
// kernel: tpu_custom_call.1
= control target key start
LH: loop header
LB: loop body
LE: loop exit
PB: predicated region body
PF: predicated region fallthrough
CT: control target
= control target key end

     0   :  { %10 = vsyncpa [#allocation3], 0  ;;  %s2201_s0 = inlined_call_operand.hbm [shape: f32[16,784], index: 0, kind: input, shape index: {}]   ;;  %s2202_s1 = inlined_call_operand.hbm [shape: bf16[784,256], index: 1, kind: input, shape index: {}]   ;;  %s2203_s2 = inlined_call_operand.vmem [shape: f32[1,256], index: 2, kind: input, shape index: {}]   ;;  %s2204_s3 = inlined_call_operand.hbm [shape: bf16[256,128], index: 3, kind: input, shape index: {}]   ;;  %s2205_s4 = inlined_call_operand.vmem [shape: f32[1,128], index: 4, kind: input, shape index: {}]   ;;  %s2206_s5 = inlined_call_operand.hbm [shape: f32[16,128], index: 5, kind: output, shape index: {}]  }
   0x1   :  { %12 = vsyncpa [#allocation3 + $0x1], 0 }
   0x2   :  { %13 = vsyncpa [#allocation6], 0 }
   0x3   :  { %14 = vsyncpa [#allocation4], 0 }
   0x4   :  { %16 = vsyncpa [#allocation4 + $0x1], 0  ;;  %s1956_s18 = smov 0   ;;  %s1958_s19 = smov 0  }
   0x5   :  { %s1960_s20 = smov 0   ;;  %s1962_s21 = smov 0  }
   0x6 LB: > { %s1977_s22 = sadd.s32 4294967295, %s1915_s21   ;;  %s1351_s23 = sadd.s32 4294967294, %s1915_s21   ;;  %s1915_s21 = sphi %s1962_s21, %s2226_s21   ;;  %s1911_s20 = sphi %s1960_s20, %s2225_s20   ;;  %s1907_s19 = sphi %s1958_s19, %s2224_s19   ;;  %s1903_s18 = sphi %s1956_s18, %s2223_s18  }
   0x7   : > { %p42_p0 = scmp.ne.s32.totalorder %s1907_s19, %s1903_s18  ;;  %p2207_p1 = scmp.eq.s32.totalorder %s1977_s22, 0 }
   0x8   : > { %p156_p3 = scmp.eq.s32.totalorder %s1351_s23, 1  ;;  %p1352_p5 = scmp.ge.s32.totalorder %s1915_s21, 1 }
   0x9   : > { %p1986_p4 = por %p2207_p1, %p42_p0  ;;  %p163_p7 = scmp.lt.s32.totalorder %s1915_s21, 3 }
   0xa   : > { %p1991_p6 = por %p156_p3, %p42_p0  ;;  %s1917_s27 = smov [#allocation5]  }
   0xb   : > { %s2210_s24 = scalar_select %p1986_p4, 1, 0 }
   0xc   : > { %s2211_s25 = scalar_select %p1991_p6, 1, 0 }
   0xd   : > { %p1996_p8 = pnand %p1352_p5, %p163_p7  ;;  %s175_s28 = sshll.u32 %s1917_s27, 4  ;;  %s2000_s28 = int_to_ptr.vmem [resolvable:$true] %s175_s28 }
   0xe   : > { %s1918_s30 = smov [#allocation7]   ;;  %s1759_s9 = scalar_lea.hbm %s2202_s1, 12544 }
   0xf   : > { %p1528_p9 = pneg %p1996_p8  ;;  %s191_s6 = sshll.u32 %s1918_s30, 4  ;;  %s2011_s6 = int_to_ptr.vmem [resolvable:$true] %s191_s6 }
  0x10   : > { %p1760_p12 = scmp.ne.s32.totalorder %s2202_s1, %s1759_s9  ;;  %p1766_p5 = scmp.lt.u32.totalorder %s1759_s9, %s2202_s1 }
  0x11   : > { %p2007_p11 = pnand %p1528_p9, %p2207_p1 }
  0x13   : > { %p1761_p13 = pneg %p2007_p11 }
  0x15   : > { %p1762_p0 = pnand %p1761_p13, %p1760_p12 }
  0x17   : > { %p1763_p3 = pneg %p1762_p0 }
  0x19   : > { %p1768_p7 = pnand %p1766_p5, %p1763_p3 }
  0x1b   : > { %1771 = shalt.err (!%p1768_p7)
}
  0x1c   : > { %s1772_s14 = scalar_lea.vmem %s2000_s28, 12544  ;;  %p1780_p2 = scmp.lt.s32.totalorder %s2000_s28, %s2000_s28 }
  0x1d   : > { %p1773_p9 = scmp.ne.s32.totalorder %s2000_s28, %s1772_s14  ;;  %p1781_p12 = scmp.lt.s32.totalorder %s1772_s14, %s1772_s14 }
  0x1f   : > { %p1775_p10 = pnand %p1773_p9, %p1761_p13  ;;  %p1782_p0 = por %p1781_p12, %p1780_p2 }
  0x21   : > { %p1776_p1 = pneg %p1775_p10 }
  0x23   : > { %p1783_p6 = pnand %p1782_p0, %p1776_p1 }
  0x25   : > { %1786 = shalt.err (!%p1783_p6)
}
  0x26   : > { %s1919_s15 = smov 128   ;;  %s1920_s16 = smov 8  }
  0x27   : > { %1531 = dma.hbm_to_vmem [thread:$0]  (!%p2007_p11), %s2202_s1, 12544, %s2000_s28, [#allocation6], %s1919_s15, %s1919_s15, %s1920_s16  }
  0x28   : > { %s1787_s7 = scalar_lea.hbm %s2204_s3, 2048 }
  0x29   : > { %p1788_p2 = scmp.ne.s32.totalorder %s2204_s3, %s1787_s7  ;;  %p1794_p10 = scmp.lt.u32.totalorder %s1787_s7, %s2204_s3 }
  0x2b   : > { %p1790_p1 = pnand %p1788_p2, %p1761_p13 }
  0x2d   : > { %p1791_p6 = pneg %p1790_p1 }
  0x2f   : > { %p1796_p3 = pnand %p1794_p10, %p1791_p6 }
  0x31   : > { %1799 = shalt.err (!%p1796_p3)
}
  0x32   : > { %s1800_s28 = scalar_lea.vmem %s2011_s6, 2048  ;;  %p1808_p12 = scmp.lt.s32.totalorder %s2011_s6, %s2011_s6 }
  0x33   : > { %p1801_p5 = scmp.ne.s32.totalorder %s2011_s6, %s1800_s28  ;;  %p1809_p0 = scmp.lt.s32.totalorder %s1800_s28, %s1800_s28 }
  0x35   : > { %p1803_p7 = pnand %p1801_p5, %p1761_p13  ;;  %p1810_p2 = por %p1809_p0, %p1808_p12 }
  0x37   : > { %p1804_p9 = pneg %p1803_p7 }
  0x39   : > { %p1811_p1 = pnand %p1810_p2, %p1804_p9 }
  0x3b   : > { %1814 = shalt.err (!%p1811_p1)
}
  0x3c   : > { %s1921_s12 = smov 64   ;;  %s1922_s13 = smov 4  }
  0x3d   : > { %1534 = dma.hbm_to_vmem [thread:$0]  (!%p2007_p11), %s2204_s3, 2048, %s2011_s6, [#allocation6], %s1921_s12, %s1921_s12, %s1922_s13  }
  0x3e   : > { %s2066_s16 = sadd.s32 1, %s1915_s21   ;;  %s29_s23 = sadd.s32 1, %s1911_s20 }
  0x3f   : > { %s26_s17 = ssub.s32 %s1915_s21, %s2066_s16  ;;  %p36_p6 = scmp.ne.s32.totalorder %s1911_s20, %s1907_s19 }
  0x40   : > { %p27_p13 = scmp.eq.s32.totalorder %s26_s17, 0  ;;  %p37_p10 = scmp.eq.s32.totalorder %s1915_s21, 0 }
  0x41   : > { %p2214_p5 = scmp.eq.s32.totalorder %s1977_s22, 1  ;;  %p1545_p9 = scmp.lt.s32.totalorder %s1915_s21, 2 }
  0x42   : > { %s2075_s27 = scalar_select %p27_p13, %s1911_s20, %s29_s23  }
  0x43   : > { %p38_p3 = por %p37_p10, %p36_p6  ;;  %p2079_p7 = por %p2214_p5, %p36_p6 }
  0x44   : > { %s208_s29 = sand.u32 1, %s1911_s20   ;;  %s1514_s6 = smul.u32 896, %s1915_s21 }
  0x45   : > { %s2215_s30 = scalar_select %p2079_p7, 1, 0 }
  0x46   : > { %s1513_s7 = smul.u32 56, %s208_s29  ;;  %p2086_p11 = pnand %p1545_p9, %p38_p3 }
  0x47   : > { %s2093_s11 = scalar_lea.hbm %s2201_s0, %s1514_s6  ;;  %s209_s13 = scalar_lea.sflag [#allocation3], %s208_s29 }
  0x48   : > { %s212_s28 = scalar_lea.vmem [#allocation2], %s1513_s7  ;;  %s1815_s14 = scalar_lea.hbm %s2093_s11, 896 }
  0x49   : > { %s220_s12 = sshll.u32 %s212_s28, 4  ;;  %p1816_p12 = scmp.ne.s32.totalorder %s2093_s11, %s1815_s14  ;;  %s2095_s12 = int_to_ptr.vmem [resolvable:$true] %s220_s12 }
  0x4a   : > { %p1817_p0 = pneg %p2086_p11  ;;  %s1820_s23 = scalar_lea.hbm %s2201_s0, 1792 }
  0x4b   : > { %p1821_p13 = scmp.lt.u32.totalorder %s2093_s11, %s2201_s0  ;;  %p1822_p6 = scmp.lt.u32.totalorder %s1820_s23, %s1815_s14 }
  0x4c   : > { %p1818_p2 = pnand %p1817_p0, %p1816_p12  ;;  %p1824_p3 = scmp.lt.u32.totalorder %s1815_s14, %s2093_s11 }
  0x4d   : > { %p1823_p10 = por %p1822_p6, %p1821_p13 }
  0x4e   : > { %p1819_p1 = pneg %p1818_p2 }
  0x4f   : > { %p1825_p5 = por %p1824_p3, %p1823_p10 }
  0x51   : > { %p1826_p9 = pnand %p1825_p5, %p1819_p1 }
  0x53   : > { %1829 = shalt.err (!%p1826_p9)
}
  0x54   : > { %s1830_s29 = scalar_lea.vmem %s2095_s12, 896  ;;  %s1923_s7 = smov [#allocation2]  }
  0x55   : > { %p1831_p12 = scmp.ne.s32.totalorder %s2095_s12, %s1830_s29  ;;  %s1835_s10 = sshll.u32 %s1923_s7, 4  ;;  %s1836_s10 = int_to_ptr.vmem [resolvable:$false] %s1835_s10 }
  0x56   : > { %s1837_s28 = scalar_lea.vmem %s1836_s10, 1792  ;;  %p1838_p4 = scmp.lt.s32.totalorder %s2095_s12, %s1836_s10 }
  0x57   : > { %p1833_p2 = pnand %p1831_p12, %p1817_p0  ;;  %p1839_p13 = scmp.lt.s32.totalorder %s1837_s28, %s1830_s29 }
  0x59   : > { %p1834_p7 = pneg %p1833_p2  ;;  %p1840_p6 = por %p1839_p13, %p1838_p4 }
  0x5b   : > { %p1841_p10 = pnand %p1840_p6, %p1834_p7 }
  0x5d   : > { %1844 = shalt.err (!%p1841_p10)
}
  0x5e   : > { %1538 = dma.hbm_to_vmem [thread:$0]  (!%p2086_p11), %s2093_s11, 896, %s2095_s12, %s209_s13  }
  0x5f   : > { %229 = sbr.rel (%p1996_p8) target bundleno = 1015 (0x3f7), region = 40  ;;  %s2125_s14 = sand.u32 (!%p1996_p8), 1, %s1907_s19  }
  0x60   : > { %s1515_s15 = smul.u32 (!%p1996_p8), 56, %s2125_s14  ;;  %s232_s17 = scalar_lea.sflag (!%p1996_p8), [#allocation3], %s2125_s14 }
  0x61   : > { %p2217_p4 = scmp.ne.s32.totalorder (!%p1996_p8), %s2210_s24, 0 }
  0x62   : > { %s2129_s23 = scalar_lea.vmem (!%p1996_p8), [#allocation2], %s1515_s15 }
  0x66   : > { %1890 = dma.done.wait (%p2217_p4), %s232_s17, 896  }
  0x67   : > { %1892 = vsyncadd (%p2217_p4), %s232_s17, 4294966400  ;;  %p2218_p7 = scmp.eq.s32.totalorder %s1977_s22, 0 }
  0x69   : > { %1894 = dma.done.wait (%p2218_p7), [#allocation6], 14592   ;;  %p2219_p8 = pmov %p2218_p7 }
  0x6a   : > { %v1588_v0 = vld [vmem:[#allocation5 + $0x104] ss:$8 sps:$4 sm:$0xff]   ;;  %v1590_v1 = vld [vmem:[#allocation5 + $0x100] ss:$8 sps:$4 sm:$0xff]   ;;  %v1591_v2 = vld [vmem:[#allocation5 + $0x114] ss:$8 sps:$4 sm:$0xff]  }
  0x6b   : > { %1896 = vsyncadd (%p2219_p8), [#allocation6], 4294952704  ;;  %930 = vmatprep.subr.bf16.mxu0 %v1588_v0  ;;  %v1593_v3 = vld [vmem:[#allocation5 + $0x110] ss:$8 sps:$4 sm:$0xff]   ;;  %v1594_v4 = vld [vmem:[#allocation5 + $0x124] ss:$8 sps:$4 sm:$0xff]  }
  0x6c   : > { %931 = vmatpush1.bf16.msra.mxu0 %v1590_v1  ;;  %v1596_v5 = vld [vmem:[#allocation5 + $0x120] ss:$8 sps:$4 sm:$0xff]   ;;  %v1597_v6 = vld [vmem:[#allocation5 + $0x134] ss:$8 sps:$4 sm:$0xff]   ;;  %v1599_v7 = vld [vmem:[#allocation5 + $0x130] ss:$8 sps:$4 sm:$0xff]  }
  0x6d   : > { %932 = vmatprep.subr.bf16.mxu0 %v1591_v2  ;;  %v1600_v8 = vld [vmem:[#allocation5 + $0x144] ss:$8 sps:$4 sm:$0xff]   ;;  %v1602_v9 = vld [vmem:[#allocation5 + $0x140] ss:$8 sps:$4 sm:$0xff]   ;;  %v1603_v10 = vld [vmem:[#allocation5 + $0x154] ss:$8 sps:$4 sm:$0xff]  }
  0x6e   : > { %v1605_v11 = vld [vmem:[#allocation5 + $0x150] ss:$8 sps:$4 sm:$0xff]   ;;  %v1630_v12 = vld [vmem:[#allocation5 + $0x4] ss:$8 sps:$4 sm:$0xff]   ;;  %v1632_v13 = vld [vmem:[#allocation5] ss:$8 sps:$4 sm:$0xff]  }
  0x6f   : > { %v1606_v14 = vld [vmem:[#allocation5 + $0x164] ss:$8 sps:$4 sm:$0xff]   ;;  %889 = vmatprep.subr.bf16.mxu1 %v1630_v12  ;;  %v1636_v15 = vld [vmem:[#allocation5 + $0x14] ss:$8 sps:$4 sm:$0xff]   ;;  %v1638_v16 = vld [vmem:[#allocation5 + $0x10] ss:$8 sps:$4 sm:$0xff]  }
  0x70   : > { %933 = vmatpush1.bf16.msra.mxu0 %v1593_v3  ;;  %890 = vmatpush1.bf16.msra.mxu1 %v1632_v13  ;;  %v1608_v17 = vld [vmem:[#allocation5 + $0x160] ss:$8 sps:$4 sm:$0xff]   ;;  %v1609_v18 = vld [vmem:[#allocation5 + $0x174] ss:$8 sps:$4 sm:$0xff]   ;;  %v1642_v19 = vld [vmem:[#allocation5 + $0x24] ss:$8 sps:$4 sm:$0xff]  }
  0x71   : > { %934 = vmatprep.subr.bf16.mxu0 %v1594_v4  ;;  %891 = vmatprep.subr.bf16.mxu1 %v1636_v15  ;;  %v274_v20 = vld [vmem:[%s2129_s23 + $0x18] sm:$0xff]  ;;  %v1611_v23 = vld [vmem:[#allocation5 + $0x170] ss:$8 sps:$4 sm:$0xff]   ;;  %v1648_v25 = vld [vmem:[#allocation5 + $0x34] ss:$8 sps:$4 sm:$0xff]   ;;  %vm885_vm0 = vcmask 130048  }
  0x72   : > { %v1644_v21 = vld [vmem:[#allocation5 + $0x20] ss:$8 sps:$4 sm:$0xff]   ;;  %v281_v22 = vpack.c.bf16 %v274_v20, %v274_v20  ;;  %v1612_v24 = vld [vmem:[#allocation5 + $0x184] ss:$8 sps:$4 sm:$0xff]   ;;  %v1650_v27 = vld [vmem:[#allocation5 + $0x30] ss:$8 sps:$4 sm:$0xff]  }
  0x73   : > { %v1614_v26 = vld [vmem:[#allocation5 + $0x180] ss:$8 sps:$4 sm:$0xff]   ;;  %v1654_v28 = vld [vmem:[#allocation5 + $0x44] ss:$8 sps:$4 sm:$0xff]   ;;  %v1615_v29 = vld [vmem:[#allocation5 + $0x194] ss:$8 sps:$4 sm:$0xff]  }
  0x74   : > { %935 = vmatpush1.bf16.msra.mxu0 %v1596_v5  ;;  %892 = vmatpush1.bf16.msra.mxu1 %v1638_v16  ;;  %v1617_v30 = vld [vmem:[#allocation5 + $0x190] ss:$8 sps:$4 sm:$0xff]   ;;  %v1656_v31 = vld [vmem:[#allocation5 + $0x40] ss:$8 sps:$4 sm:$0xff]   ;;  %v1660_v32 = vld [vmem:[#allocation5 + $0x54] ss:$8 sps:$4 sm:$0xff]  }
  0x75   : > { %936 = vmatprep.subr.bf16.mxu0 %v1597_v6  ;;  %893 = vmatprep.subr.bf16.mxu1 %v1642_v19  ;;  %v1618_v33 = vld [vmem:[#allocation5 + $0x1a4] ss:$8 sps:$4 sm:$0xff]   ;;  %v1620_v34 = vld [vmem:[#allocation5 + $0x1a0] ss:$8 sps:$4 sm:$0xff]   ;;  %v1662_v35 = vld [vmem:[#allocation5 + $0x50] ss:$8 sps:$4 sm:$0xff]  }
  0x76   : > { %962 = vmatprep.mubr.bf16.mxu0 %v281_v22  ;;  %v1666_v36 = vld [vmem:[#allocation5 + $0x64] ss:$8 sps:$4 sm:$0xff]   ;;  %v1621_v37 = vld [vmem:[#allocation5 + $0x1b4] ss:$8 sps:$4 sm:$0xff]   ;;  %v1623_v38 = vld [vmem:[#allocation5 + $0x1b0] ss:$8 sps:$4 sm:$0xff]  }
  0x77   : > { %v1668_v39 = vld [vmem:[#allocation5 + $0x60] ss:$8 sps:$4 sm:$0xff]   ;;  %v1672_v40 = vld [vmem:[#allocation5 + $0x74] ss:$8 sps:$4 sm:$0xff]   ;;  %v1624_v41 = vld [vmem:[#allocation5 + $0x1c4] ss:$8 sps:$4 sm:$0xff]  }
  0x78   : > { %937 = vmatpush1.bf16.msra.mxu0 %v1599_v7  ;;  %894 = vmatpush1.bf16.msra.mxu1 %v1644_v21  ;;  %v1626_v42 = vld [vmem:[#allocation5 + $0x1c0] ss:$8 sps:$4 sm:$0xff]   ;;  %v1674_v43 = vld [vmem:[#allocation5 + $0x70] ss:$8 sps:$4 sm:$0xff]   ;;  %v1678_v44 = vld [vmem:[#allocation5 + $0x84] ss:$8 sps:$4 sm:$0xff]  }
  0x79   : > { %938 = vmatprep.subr.bf16.mxu0 %v1600_v8  ;;  %895 = vmatprep.subr.bf16.mxu1 %v1648_v25  ;;  %v1627_v45 = vld [vmem:[#allocation5 + $0x1d4] ss:$8 sps:$4 sm:$0xff]   ;;  %v1629_v46 = vld [vmem:[#allocation5 + $0x1d0] ss:$8 sps:$4 sm:$0xff]   ;;  %v1680_v47 = vld [vmem:[#allocation5 + $0x80] ss:$8 sps:$4 sm:$0xff]  }
  0x7a   : > { %v1684_v48 = vld [vmem:[#allocation5 + $0x94] ss:$8 sps:$4 sm:$0xff]   ;;  %v1633_v49 = vld [vmem:[#allocation5 + $0x1e4] ss:$8 sps:$4 sm:$0xff]   ;;  %v1635_v50 = vld [vmem:[#allocation5 + $0x1e0] ss:$8 sps:$4 sm:$0xff]  }
  0x7b   : > { %v1686_v51 = vld [vmem:[#allocation5 + $0x90] ss:$8 sps:$4 sm:$0xff]   ;;  %v1690_v52 = vld [vmem:[#allocation5 + $0xa4] ss:$8 sps:$4 sm:$0xff]   ;;  %v1639_v53 = vld [vmem:[#allocation5 + $0x1f4] ss:$8 sps:$4 sm:$0xff]  }
  0x7c   : > { %939 = vmatpush1.bf16.msra.mxu0 %v1602_v9  ;;  %896 = vmatpush1.bf16.msra.mxu1 %v1650_v27  ;;  %v1641_v54 = vld [vmem:[#allocation5 + $0x1f0] ss:$8 sps:$4 sm:$0xff]   ;;  %v1692_v56 = vld [vmem:[#allocation5 + $0xa0] ss:$8 sps:$4 sm:$0xff]   ;;  %v1696_v57 = vld [vmem:[#allocation5 + $0xb4] ss:$8 sps:$4 sm:$0xff]  }
  0x7d   : > { %940 = vmatprep.subr.bf16.mxu0 %v1603_v10  ;;  %897 = vmatprep.subr.bf16.mxu1 %v1654_v28  ;;  %v273_v55 = vld [vmem:[%s2129_s23 + $0x10] sm:$0xff]  ;;  %v272_v61 = vld [vmem:[%s2129_s23 + $0x8] sm:$0xff]  ;;  %v1924_v25 = vmov 0   ;;  %s1360_s12 = sshll.u32 %s2125_s14, 3  ;;  %s1478_s13 = sshll.u32 %s1977_s22, 7 }
  0x7e   : > { %v1647_v58 = vld [vmem:[#allocation5 + $0x204] ss:$8 sps:$4 sm:$0xff]   ;;  %v280_v59 = vpack.c.bf16 %v273_v55, %v273_v55  ;;  %v1698_v60 = vld [vmem:[#allocation5 + $0xb0] ss:$8 sps:$4 sm:$0xff]   ;;  %v1645_v62 = vld [vmem:[#allocation5 + $0x200] ss:$8 sps:$4 sm:$0xff]   ;;  %v279_v0 = vpack.c.bf16 %v272_v61, %v272_v61  ;;  %s2157_s10 = scalar_lea.hbm %s2206_s5, %s1478_s13 }
  0x7f   : > { %v1702_v63 = vld [vmem:[#allocation5 + $0xc4] ss:$8 sps:$4 sm:$0xff]   ;;  %v1653_v1 = vld [vmem:[#allocation5 + $0x214] ss:$8 sps:$4 sm:$0xff]   ;;  %v1704_v2 = vld [vmem:[#allocation5 + $0xc0] ss:$8 sps:$4 sm:$0xff]  }
  0x80   : > { %941 = vmatpush1.bf16.msra.mxu0 %v1605_v11  ;;  %898 = vmatpush1.bf16.msra.mxu1 %v1656_v31  ;;  %v276_v3 = vld [vmem:[%s2129_s23 + $0x28] sm:$0xff]  ;;  %v1659_v5 = vld [vmem:[#allocation5 + $0x224] ss:$8 sps:$4 sm:$0xff]   ;;  %v1657_v9 = vld [vmem:[#allocation5 + $0x220] ss:$8 sps:$4 sm:$0xff]   ;;  %s269_s6 = scalar_lea.vmem [#allocation8], %s1360_s12 }
  0x81   : > { %942 = vmatprep.subr.bf16.mxu0 %v1606_v14  ;;  %899 = vmatprep.subr.bf16.mxu1 %v1660_v32  ;;  %v1651_v4 = vld [vmem:[#allocation5 + $0x210] ss:$8 sps:$4 sm:$0xff]   ;;  %v1708_v6 = vld [vmem:[#allocation5 + $0xd4] ss:$8 sps:$4 sm:$0xff]   ;;  %v283_v7 = vpack.c.bf16 %v276_v3, %v276_v3  ;;  %v1714_v10 = vld [vmem:[#allocation5 + $0xe4] ss:$8 sps:$4 sm:$0xff]  }
  0x82   : > { %921 = vmatprep.mubr.bf16.mxu1 %v279_v0  ;;  %v1710_v8 = vld [vmem:[#allocation5 + $0xd0] ss:$8 sps:$4 sm:$0xff]   ;;  %v1665_v11 = vld [vmem:[#allocation5 + $0x234] ss:$8 sps:$4 sm:$0xff]   ;;  %v1716_v12 = vld [vmem:[#allocation5 + $0xe0] ss:$8 sps:$4 sm:$0xff]  }
  0x83   : > { %v1663_v13 = vld [vmem:[#allocation5 + $0x230] ss:$8 sps:$4 sm:$0xff]   ;;  %v1720_v14 = vld [vmem:[#allocation5 + $0xf4] ss:$8 sps:$4 sm:$0xff]   ;;  %v1671_v15 = vld [vmem:[#allocation5 + $0x244] ss:$8 sps:$4 sm:$0xff]  }
  0x84   : > { %943 = vmatpush1.bf16.msra.mxu0 %v1608_v17  ;;  %900 = vmatpush1.bf16.msra.mxu1 %v1662_v35  ;;  %v1722_v16 = vld [vmem:[#allocation5 + $0xf0] ss:$8 sps:$4 sm:$0xff]   ;;  %v1731_v19 = vld [vmem:[#allocation5 + $0x304] ss:$8 sps:$4 sm:$0xff]   ;;  %v1677_v20 = vld [vmem:[#allocation5 + $0x254] ss:$8 sps:$4 sm:$0xff]  }
  0x85   : > { %944 = vmatprep.subr.bf16.mxu0 %v1609_v18  ;;  %901 = vmatprep.subr.bf16.mxu1 %v1666_v36  ;;  %v271_v17 = vld [vmem:[%s2129_s23] sm:$0xff]  ;;  %v1747_v61 = vld [vmem:[#allocation7 + $0x70] sm:$0xff]   ;;  %s1262_s9 = sshll.u32 %s269_s6, 4  ;;  %s1249_s28 = scalar_lea.sflag [#allocation4], %s2125_s14  ;;  %s2159_s9 = int_to_ptr.vmem [resolvable:$true] %s1262_s9 }
  0x86   : > { %v1669_v18 = vld [vmem:[#allocation5 + $0x240] ss:$8 sps:$4 sm:$0xff]   ;;  %v278_v21 = vpack.c.bf16 %v271_v17, %v271_v17  ;;  %v1689_v28 = vld [vmem:[#allocation5 + $0x274] ss:$8 sps:$4 sm:$0xff]   ;;  %v1695_v31 = vld [vmem:[#allocation5 + $0x284] ss:$8 sps:$4 sm:$0xff]  }
  0x87   : > { %v1729_v22 = vld [vmem:[#allocation5 + $0x300] ss:$8 sps:$4 sm:$0xff]   ;;  %v1707_v35 = vld [vmem:[#allocation5 + $0x2a4] ss:$8 sps:$4 sm:$0xff]   ;;  %s1845_s15 = scalar_lea.vmem %s2159_s9, 128  ;;  %p2220_p0 = scmp.ne.s32.totalorder %s2215_s30, 0 }
  0x88   : > { %945 = vmatpush1.bf16.msra.mxu0 %v1611_v23  ;;  %902 = vmatpush1.bf16.msra.mxu1 %v1668_v39  ;;  %v1675_v23 = vld [vmem:[#allocation5 + $0x250] ss:$8 sps:$4 sm:$0xff]   ;;  %v1681_v27 = vld [vmem:[#allocation5 + $0x260] ss:$8 sps:$4 sm:$0xff]   ;;  %v1719_v39 = vld [vmem:[#allocation5 + $0x2c4] ss:$8 sps:$4 sm:$0xff]   ;;  %p1846_p11 = scmp.ne.s32.totalorder %s2159_s9, %s1845_s15 }
  0x89   : > { %946 = vmatprep.subr.bf16.mxu0 %v1612_v24  ;;  %903 = vmatprep.subr.bf16.mxu1 %v1672_v40  ;;  %v1683_v24 = vld [vmem:[#allocation5 + $0x264] ss:$8 sps:$4 sm:$0xff]   ;;  %v1693_v32 = vld [vmem:[#allocation5 + $0x280] ss:$8 sps:$4 sm:$0xff]   ;;  %s1925_s22 = smov [#allocation8]  }
  0x8a   : > { %v1705_v36 = vld [vmem:[#allocation5 + $0x2a0] ss:$8 sps:$4 sm:$0xff]   ;;  %p1847_p1 = pnand %p1846_p11, %p2220_p0  ;;  %s1849_s17 = sshll.u32 %s1925_s22, 4  ;;  %s1850_s17 = int_to_ptr.vmem [resolvable:$false] %s1849_s17 }
  0x8b   : > { %v1717_v40 = vld [vmem:[#allocation5 + $0x2c0] ss:$8 sps:$4 sm:$0xff]   ;;  %p1852_p5 = scmp.lt.s32.totalorder %s2159_s9, %s1850_s17 }
  0x8c   : > { %947 = vmatpush1.bf16.msra.mxu0 %v1614_v26  ;;  %904 = vmatpush1.bf16.msra.mxu1 %v1674_v43  ;;  %v277_v26 = vld [vmem:[%s2129_s23 + $0x30] sm:$0xff]  ;;  %v1741_v55 = vld [vmem:[#allocation7 + $0x58] sm:$0xff]   ;;  %p1848_p3 = pneg %p1847_p1 }
  0x8d   : > { %948 = vmatprep.subr.bf16.mxu0 %v1615_v29  ;;  %905 = vmatprep.subr.bf16.mxu1 %v1678_v44  ;;  %v284_v29 = vpack.c.bf16 %v277_v26, %v277_v26  ;;  %v1728_v43 = vld [vmem:[#allocation5 + $0x2e4] ss:$8 sps:$4 sm:$0xff]   ;;  %v1726_v44 = vld [vmem:[#allocation5 + $0x2e0] ss:$8 sps:$4 sm:$0xff]  }
  0x8e   : > { %v1750_v0 = vld [vmem:[#allocation7 + $0x38] sm:$0xff]  }
  0x90   : > { %949 = vmatpush1.bf16.msra.mxu0 %v1617_v30  ;;  %906 = vmatpush1.bf16.msra.mxu1 %v1680_v47  ;;  %v1687_v30 = vld [vmem:[#allocation5 + $0x270] ss:$8 sps:$4 sm:$0xff]  }
  0x91   : > { %950 = vmatprep.subr.bf16.mxu0 %v1618_v33  ;;  %907 = vmatprep.subr.bf16.mxu1 %v1684_v48  ;;  %v1701_v33 = vld [vmem:[#allocation5 + $0x294] ss:$8 sps:$4 sm:$0xff]  }
  0x92   : > { %v275_v47 = vld [vmem:[%s2129_s23 + $0x20] sm:$0xff]  ;;  %s1851_s23 = scalar_lea.vmem %s1850_s17, 256 }
  0x93   : > { %v282_v48 = vpack.c.bf16 %v275_v47, %v275_v47  ;;  %p1853_p9 = scmp.lt.s32.totalorder %s1851_s23, %s1845_s15 }
  0x94   : > { %951 = vmatpush1.bf16.msra.mxu0 %v1620_v34  ;;  %908 = vmatpush1.bf16.msra.mxu1 %v1686_v51  ;;  %v1699_v34 = vld [vmem:[#allocation5 + $0x290] ss:$8 sps:$4 sm:$0xff]  }
  0x95   : > { %952 = vmatprep.subr.bf16.mxu0 %v1621_v37  ;;  %909 = vmatprep.subr.bf16.mxu1 %v1690_v52  ;;  %v1713_v37 = vld [vmem:[#allocation5 + $0x2b4] ss:$8 sps:$4 sm:$0xff]   ;;  %p1854_p12 = por %p1853_p9, %p1852_p5 }
  0x96   : > { %v1737_v51 = vld [vmem:[#allocation7 + $0x48] sm:$0xff]  }
  0x97   : > { %v1738_v52 = vld [vmem:[#allocation7 + $0x8] sm:$0xff]   ;;  %p1855_p2 = pnand %p1854_p12, %p1848_p3 }
  0x98   : > { %953 = vmatpush1.bf16.msra.mxu0 %v1623_v38  ;;  %910 = vmatpush1.bf16.msra.mxu1 %v1692_v56  ;;  %v1711_v38 = vld [vmem:[#allocation5 + $0x2b0] ss:$8 sps:$4 sm:$0xff]   ;;  %v1742_v56 = vld [vmem:[#allocation7 + $0x18] sm:$0xff]  }
  0x99   : > { %954 = vmatprep.subr.bf16.mxu0 %v1624_v41  ;;  %911 = vmatprep.subr.bf16.mxu1 %v1696_v57  ;;  %v1725_v41 = vld [vmem:[#allocation5 + $0x2d4] ss:$8 sps:$4 sm:$0xff]  }
  0x9a   : > { %v1743_v57 = vld [vmem:[#allocation7 + $0x60] sm:$0xff]  }
  0x9c   : > { %955 = vmatpush1.bf16.msra.mxu0 %v1626_v42  ;;  %912 = vmatpush1.bf16.msra.mxu1 %v1698_v60  ;;  %v1723_v42 = vld [vmem:[#allocation5 + $0x2d0] ss:$8 sps:$4 sm:$0xff]  }
  0x9d   : > { %956 = vmatprep.subr.bf16.mxu0 %v1627_v45  ;;  %913 = vmatprep.subr.bf16.mxu1 %v1702_v63  ;;  %v1734_v45 = vld [vmem:[#allocation5 + $0x2f4] ss:$8 sps:$4 sm:$0xff]   ;;  %v1749_v63 = vld [vmem:[#allocation7 + $0x78] sm:$0xff]  }
  0x9e   : > { %v1746_v60 = vld [vmem:[#allocation7 + $0x28] sm:$0xff]  }
  0xa0   : > { %957 = vmatpush1.bf16.msra.mxu0 %v1629_v46  ;;  %914 = vmatpush1.bf16.msra.mxu1 %v1704_v2  ;;  %v1732_v46 = vld [vmem:[#allocation5 + $0x2f0] ss:$8 sps:$4 sm:$0xff]  }
  0xa1   : > { %958 = vmatprep.subr.bf16.mxu0 %v1633_v49  ;;  %915 = vmatprep.subr.bf16.mxu1 %v1708_v6  ;;  %v1735_v49 = vld [vmem:[#allocation7 + $0x40] sm:$0xff]  }
  0xa4   : > { %959 = vmatpush1.bf16.msra.mxu0 %v1635_v50  ;;  %916 = vmatpush1.bf16.msra.mxu1 %v1710_v8  ;;  %v1736_v50 = vld [vmem:[#allocation7] sm:$0xff]  }
  0xa5   : > { %960 = vmatprep.subr.bf16.mxu0 %v1639_v53  ;;  %917 = vmatprep.subr.bf16.mxu1 %v1714_v10  ;;  %v1739_v53 = vld [vmem:[#allocation7 + $0x50] sm:$0xff]  }
  0xa8   : > { %961 = vmatpush1.bf16.msra.mxu0 %v1641_v54  ;;  %918 = vmatpush1.bf16.msra.mxu1 %v1716_v12  ;;  %v1740_v54 = vld [vmem:[#allocation7 + $0x10] sm:$0xff]   ;;  %v383_v12 = vld [vmem:[%s2203_s2] sm:$0x3] }
  0xa9   : > { %971 = vmatprep.subr.bf16.mxu0 %v1647_v58  ;;  %919 = vmatprep.subr.bf16.mxu1 %v1720_v14  ;;  %v1744_v58 = vld [vmem:[#allocation7 + $0x20] sm:$0xff]  }
  0xab   : > { %963 = vmatmul.mubr.bf16.vlgmr.msra.gmra.mrb[0].mxu0 %v280_v59  ;;  %v1745_v59 = vld [vmem:[#allocation7 + $0x68] sm:$0xff]  }
  0xac   : > { %972 = vmatpush1.bf16.msra.mxu0 %v1645_v62  ;;  %1003 = vmatprep.mubr.bf16.mxu0 %v283_v7  ;;  %v1748_v62 = vld [vmem:[#allocation7 + $0x30] sm:$0xff]  }
  0xad   : > { %973 = vmatprep.subr.bf16.mxu0 %v1653_v1  ;;  %920 = vmatpush1.bf16.msra.mxu1 %v1722_v16 }
  0xae   : > { %1012 = vmatprep.subr.bf16.mxu1 %v1731_v19 }
  0xb0   : > { %974 = vmatpush1.bf16.msra.mxu0 %v1651_v4  ;;  %922 = vmatmul.mubr.bf16.vlgmr.msra.gmra.mrb[0].mxu1 %v278_v21 }
  0xb1   : > { %975 = vmatprep.subr.bf16.mxu0 %v1659_v5  ;;  %1013 = vmatpush1.bf16.msra.mxu1 %v1729_v22 }
  0xb2   : > { %1044 = vmatprep.mubr.bf16.mxu1 %v1924_v25  ;;  %1481 = vmatprep.subr.bf16.mxu1 %v1735_v49 }
  0xb4   : > { %976 = vmatpush1.bf16.msra.mxu0 %v1657_v9  ;;  %v385_v9 = vlaneseq }
  0xb5   : > { %977 = vmatprep.subr.bf16.mxu0 %v1665_v11 }
  0xb6   : > { %v386_v10 = vshrl.u32 %v385_v9, 7 }
  0xb8   : > { %978 = vmatpush1.bf16.msra.mxu0 %v1663_v13  ;;  %1459 = vmatmul.mubr.msk.bf16.vlgmr.msra.gmra.mrb[4].mxu1 %vm885_vm0, %v284_v29  ;;  %v387_v11 = vsub.s32 0, %v386_v10  ;;  %v391_v13 = vsub.s32 1, %v386_v10 }
  0xb9   : > { %979 = vmatprep.subr.bf16.mxu0 %v1671_v15  ;;  %1482 = vmatpush3.bf16.msra.mxu1 %v1736_v50 }
  0xba   : > { %1483 = vmatprep.subr.bf16.mxu1 %v1737_v51  ;;  %v388_v14 = vrot.slane %v383_v12, %v387_v11  ;;  %v392_v15 = vrot.slane %v383_v12, %v391_v13 }
  0xbc   : > { %980 = vmatpush1.bf16.msra.mxu0 %v1669_v18 }
  0xbd   : > { %981 = vmatprep.subr.bf16.mxu0 %v1677_v20  ;;  %1484 = vmatpush3.bf16.msra.mxu1 %v1738_v52 }
  0xbe   : > { %1485 = vmatprep.subr.bf16.mxu1 %v1739_v53 }
  0xc0   : > { %982 = vmatpush1.bf16.msra.mxu0 %v1675_v23 }
  0xc1   : > { %983 = vmatprep.subr.bf16.mxu0 %v1683_v24  ;;  %1486 = vmatpush3.bf16.msra.mxu1 %v1740_v54 }
  0xc2   : > { %1487 = vmatprep.subr.bf16.mxu1 %v1741_v55 }
  0xc4   : > { %984 = vmatpush1.bf16.msra.mxu0 %v1681_v27 }
  0xc5   : > { %985 = vmatprep.subr.bf16.mxu0 %v1689_v28  ;;  %1488 = vmatpush3.bf16.msra.mxu1 %v1742_v56 }
  0xc6   : > { %1489 = vmatprep.subr.bf16.mxu1 %v1743_v57 }
  0xc8   : > { %986 = vmatpush1.bf16.msra.mxu0 %v1687_v30 }
  0xc9   : > { %987 = vmatprep.subr.bf16.mxu0 %v1695_v31  ;;  %1490 = vmatpush3.bf16.msra.mxu1 %v1744_v58 }
  0xca   : > { %1491 = vmatprep.subr.bf16.mxu1 %v1745_v59 }
  0xcc   : > { %988 = vmatpush1.bf16.msra.mxu0 %v1693_v32 }
  0xcd   : > { %989 = vmatprep.subr.bf16.mxu0 %v1701_v33  ;;  %1492 = vmatpush3.bf16.msra.mxu1 %v1746_v60 }
  0xce   : > { %1493 = vmatprep.subr.bf16.mxu1 %v1747_v61 }
  0xd0   : > { %990 = vmatpush1.bf16.msra.mxu0 %v1699_v34 }
  0xd1   : > { %991 = vmatprep.subr.bf16.mxu0 %v1707_v35  ;;  %1494 = vmatpush3.bf16.msra.mxu1 %v1748_v62 }
  0xd2   : > { %1495 = vmatprep.subr.bf16.mxu1 %v1749_v63 }
  0xd4   : > { %992 = vmatpush1.bf16.msra.mxu0 %v1705_v36 }
  0xd5   : > { %993 = vmatprep.subr.bf16.mxu0 %v1713_v37  ;;  %1496 = vmatpush3.bf16.msra.mxu1 %v1750_v0 }
  0xd8   : > { %994 = vmatpush1.bf16.msra.mxu0 %v1711_v38  ;;  %v1460_v38 = vld [vmem:[%s2205_s4] ss:$0 sm:$0xff] }
  0xd9   : > { %995 = vmatprep.subr.bf16.mxu0 %v1719_v39 }
  0xdc   : > { %996 = vmatpush1.bf16.msra.mxu0 %v1717_v40 }
  0xdd   : > { %997 = vmatprep.subr.bf16.mxu0 %v1725_v41 }
  0xe0   : > { %998 = vmatpush1.bf16.msra.mxu0 %v1723_v42 }
  0xe1   : > { %999 = vmatprep.subr.bf16.mxu0 %v1728_v43 }
  0xe4   : > { %1000 = vmatpush1.bf16.msra.mxu0 %v1726_v44 }
  0xe5   : > { %1001 = vmatprep.subr.bf16.mxu0 %v1734_v45 }
  0xe8   : > { %1002 = vmatpush1.bf16.msra.mxu0 %v1732_v46 }
  0xeb   : > { %1004 = vmatmul.mubr.bf16.vlgmr.msra.gmra.mrb[0].mxu0 %v282_v48 }
 0x183   : > { %v923_v1 = vpop.f32.mrb[0].mxu1 }
 0x184   : > { %v925_v2 = vpop.f32.mrb[1].mxu1  ;;  %v924_v16 = vadd.f32 %v923_v1, %v388_v14 }
 0x185   : > { %v927_v3 = vpop.f32.mrb[2].mxu1  ;;  %v926_v17 = vadd.f32 %v925_v2, %v392_v15 }
 0x186   : > { %v928_v4 = vpop.f32.mrb[3].mxu1 }
 0x18b   : > { %v1046_v5 = vpop.f32.mrb[4].mxu1 }
 0x18c   : > { %v1048_v6 = vpop.f32.mrb[5].mxu1 }
 0x18d   : > { %v1050_v7 = vpop.f32.mrb[6].mxu1 }
 0x18e   : > { %v1051_v8 = vpop.f32.mrb[7].mxu1 }
 0x1be   : > { %v1005_v18 = vpop.f32.mrb[0].mxu0 }
 0x1bf   : > { %v1504_v19 = vadd.f32 %v1005_v18, %v924_v16  ;;  %v1007_v20 = vpop.f32.mrb[1].mxu0 }
 0x1c0   : > { %v1507_v21 = vadd.f32 %v1007_v20, %v926_v17  ;;  %v1009_v22 = vpop.f32.mrb[2].mxu0 }
 0x1c1   : > { %v1505_v23 = vadd.f32 %v1504_v19, %v1046_v5  ;;  %v1010_v24 = vpop.f32.mrb[3].mxu0 }
 0x1c2   : > { %v1508_v25 = vadd.f32 %v1507_v21, %v1048_v6 }
 0x1c3   : > { %v1053_v26 = vmul.f32 0.5, %v1505_v23 }
 0x1c4   : > { %v1054_v27 = vmul.f32 0.5, %v1508_v25 }
 0x1c5   : > { %1751 = vtanh.f32 %v1053_v26 }
 0x1c6   : > { %1753 = vtanh.f32 %v1054_v27 }
 0x1cf   : > { %v1752_v28 = vpop.eup %1751 }
 0x1d0   : > { %v1754_v29 = vpop.eup %1753  ;;  %v1057_v30 = vmul.f32 0.5, %v1752_v28 }
 0x1d1   : > { %v1058_v31 = vmul.f32 0.5, %v1754_v29 }
 0x1d2   : > { %v1059_v32 = vadd.f32 0.5, %v1057_v30 }
 0x1d3   : > { %v1060_v33 = vadd.f32 0.5, %v1058_v31 }
 0x1d4   : > { %v1061_v35 = vpack.c.bf16 %v1059_v32, %v1059_v32 }
 0x1d5   : > { %v1062_v34 = vpack.c.bf16 %v1060_v33, %v1060_v33 }
 0x1d7   : > { %1230 = vmatprep.mubr.bf16.mxu1 %v1062_v34 }
 0x1d8   : > { %1231 = vmatmul.mubr.bf16.vlgmr.msra.gmra.mrb[8].mxu1 %v1061_v35 }
 0x2ab   : > { %v1497_v36 = vpop.f32.mrb[8].mxu1 }
 0x2ac   : > { %v1498_v37 = vpop.f32.mrb[9].mxu1 }
 0x2ad   : > { %v1499_v39 = vadd.f32 %v1498_v37, %v1497_v36  ;;  %v1500_v40 = vpop.f32.mrb[10].mxu1 }
 0x2ae   : > { %v1501_v41 = vpop.f32.mrb[11].mxu1 }
 0x2af   : > { %v1233_v42 = vadd.f32 %v1499_v39, %v1460_v38 }
 0x2b1   : > { %1238 = vmax.xlane.f32.xlu0 %v1233_v42 }
 0x33e   : > { %v1239_v43 = vpop.xlane.xlu0 %1238 }
 0x33f   : > { %v1240_v44 = vsub.f32 %v1233_v42, %v1239_v43 }
 0x341   : > { %v1241_v45 = vmul.f32 1.442695, %v1240_v44 }
 0x343   : > { %1755 = vpow2.f32 %v1241_v45 }
 0x34d   : > { %v1756_v46 = vpop.eup %1755 }
 0x34e   : > { %1243 = vadd.xlane.f32.xlu0 %v1756_v46 }
 0x3db   : > { %v1244_v47 = vpop.xlane.xlu0 %1243 }
 0x3dc   : > { %1757 = vrcp.f32 %v1244_v47 }
 0x3e6   : > { %v1758_v48 = vpop.eup %1757 }
 0x3e7   : > { %v1246_v49 = vmul.f32 %v1758_v48, %v1756_v46 }
 0x3e9   : > { %1247 = vst [vmem:[%s269_s6] sm:$0xff] %v1246_v49 }
 0x3ea   : > { %1858 = shalt.err (!%p1855_p2)
}
 0x3eb   : > { %s1859_s14 = scalar_lea.hbm %s2157_s10, 128  ;;  %s1863_s8 = scalar_lea.hbm %s2206_s5, 256 }
 0x3ec   : > { %p1860_p13 = scmp.ne.s32.totalorder %s2157_s10, %s1859_s14  ;;  %p1864_p4 = scmp.lt.u32.totalorder %s2157_s10, %s2206_s5 }
 0x3ed   : > { %p1865_p7 = scmp.lt.u32.totalorder %s1863_s8, %s1859_s14  ;;  %p1867_p11 = scmp.lt.u32.totalorder %s1859_s14, %s2157_s10 }
 0x3ee   : > { %p1861_p6 = pnand %p1860_p13, %p2220_p0 }
 0x3ef   : > { %p1866_p8 = por %p1865_p7, %p1864_p4 }
 0x3f0   : > { %p1862_p10 = pneg %p1861_p6 }
 0x3f1   : > { %p1868_p1 = por %p1867_p11, %p1866_p8 }
 0x3f3   : > { %p1869_p3 = pnand %p1868_p1, %p1862_p10 }
 0x3f5   : > { %1872 = shalt.err (!%p1869_p3)
}
 0x3f6   : > { %1526 = dma.vmem_to_hbm [thread:$0]  (%p2220_p0), %s2159_s9, 128, %s2157_s10, %s1249_s28  }
 0x3f7 PF: > { %s1274_s13 = sand.u32 1, %s1903_s18   ;;  %p2221_p5 = scmp.ne.s32.totalorder %s2211_s25, 0 }
 0x3f8   : > { %p2222_p9 = scmp.ge.s32.totalorder %s1915_s21, 2  ;;  %s1275_s6 = scalar_lea.sflag [#allocation4], %s1274_s13 }
 0x3fa   : > { %p1540_p12 = pnand %p2222_p9, %p2221_p5 }
 0x3fc   : > { %1898 = dma.done.wait (!%p1540_p12), %s1275_s6, 128  }
 0x3fd   : > { %1900 = vsyncadd (!%p1540_p12), %s1275_s6, 4294967168  ;;  %p19_p2 = scmp.ge.s32.totalorder %s2066_s16, 4   ;;  %s2223_s18 = smov %s1907_s19 }
 0x3fe   : > { %s2224_s19 = smov %s1911_s20  ;;  %s2225_s20 = smov %s2075_s27 }
 0x3ff   : > { %s2226_s21 = smov %s2066_s16  ;;  %21 = sbr.rel (!%p19_p2) target bundleno = 6 (0x6), region = 93 }
 0x406   :  { %1280 = vsyncpa [#allocation3], 1 }
 0x407   :  { %1282 = vsyncpa [#allocation3 + $0x1], 1 }
 0x408   :  { %1283 = vsyncpa [#allocation6], 1 }
 0x409   :  { %1284 = vsyncpa [#allocation4], 1 }
 0x40a   :  { %1286 = vsyncpa [#allocation4 + $0x1], 1 }

</bundles_post_ra>
